<compile_context>
chip_gen: v6e
topology: v6e:2x2x1
jax: 0.10.0
libtpu: 0.0.40
codegen_flags: <defaults>
</compile_context>

<pallas_src>
import functools

import jax
import jax.numpy as jnp
from jax.experimental import pallas as pl
from jax.experimental.pallas import tpu as pltpu


# ----------------------------------------------------------------------------
# Kernel
# ----------------------------------------------------------------------------
def _make_fused_nac_kernel(num_layers, compute_dtype):
    """Fused kernel over all NAC cells.

    Ref layout:
      refs[0]                : x tile             (tb, in_dim)
      refs[1 : 1+L]          : W_l (pre-transposed, (in_l, out_l))
      refs[1+L]              : output tile        (tb, out_dim)
    """

    def kernel(*refs):
        x_ref = refs[0]
        w_refs = refs[1:1 + num_layers]
        o_ref = refs[1 + num_layers]

        # Chain of matmuls; the activation never leaves the chip.
        # MXU accumulation is always f32; inputs are cast to compute_dtype
        # (f32 by default, bf16 opt-in for higher MXU throughput).
        h = x_ref[...]
        for l in range(num_layers):
            h = jnp.dot(h.astype(compute_dtype), w_refs[l][...],
                        preferred_element_type=jnp.float32)
        o_ref[...] = h.astype(o_ref.dtype)

    return kernel


# ----------------------------------------------------------------------------
# VMEM-aware planning (runs eagerly, outside jit)
# ----------------------------------------------------------------------------
_VMEM_FALLBACK_BYTES = 64 * 1024 * 1024  # v7x per-TC VMEM, smallest modern part


def _vmem_capacity_bytes():
    try:
        return int(pltpu.get_tpu_info().vmem_capacity_bytes)
    except Exception:  # e.g. interpret mode / query unavailable
        return _VMEM_FALLBACK_BYTES


def _plan_tiling(batch, layer_widths, x_itemsize, w_itemsize, max_batch_tile):
    """Pick the batch tile / padding / vmem limit from the VMEM budget.

    layer_widths = [in_dim, hidden, ..., hidden, out_dim]
    """
    in_dim, out_dim = layer_widths[0], layer_widths[-1]
    max_width = max(layer_widths)

    weight_bytes = sum(layer_widths[i] * layer_widths[i + 1]
                       for i in range(len(layer_widths) - 1)) * w_itemsize
    resident_w = 2 * weight_bytes  # each weight input is double-buffered

    vmem_cap = _vmem_capacity_bytes()
    budget = int(vmem_cap * 0.75)  # ~25% headroom for compiler scratch/spills

    # Per-row cost: double-buffered x and out tiles plus one f32 copy of the
    # widest live activation (held in vregs / spilled to VMEM).
    per_row = 2 * (in_dim + out_dim) * x_itemsize + max_width * 4

    avail = budget - resident_w
    if avail <= per_row * 8:
        # Weights alone nearly fill VMEM.
        # TODO(synk): switch to a K-tiled streamed weight pipeline here.
        tb = 8
    else:
        tb = min(8192, max(8, (avail // per_row) // 8 * 8))

    if max_batch_tile is not None:
        tb = max(8, (min(tb, int(max_batch_tile)) // 8) * 8)

    if batch <= tb:
        tb_final = batch           # single full-array tile (no padding needed)
        padded_batch = batch
    else:
        tb_final = tb              # multiple of 8 -> legal sublane tiling
        padded_batch = pl.cdiv(batch, tb_final) * tb_final

    est = (resident_w
           + 2 * tb_final * (in_dim + out_dim) * x_itemsize
           + tb_final * max_width * 4)
    vmem_limit = int(min(vmem_cap, max(2 * est, 32 * 1024 * 1024)))
    return tb_final, padded_batch, vmem_limit


# ----------------------------------------------------------------------------
# Forward pass
# ----------------------------------------------------------------------------
@functools.partial(
    jax.jit,
    static_argnames=("tb", "padded_batch", "vmem_limit", "compute_dtype"))
def _nac_forward_pallas(x, params, *, tb, padded_batch, vmem_limit,
                        compute_dtype):
    num_layers = len(params)
    batch, in_dim = x.shape
    out_dim = params[-1][0].shape[0]
    dtype = x.dtype

    # Build the effective weights once in the wrapper (cheap, fused by XLA)
    # and pre-transpose to (in_features, out_features): the kernel computes
    # h @ W directly (no in-kernel transpose, lane-dense output dim).
    ws = []
    for w_hat, m_hat in params:
        w = jnp.tanh(w_hat.astype(jnp.float32)) * \
            jax.nn.sigmoid(m_hat.astype(jnp.float32))
        ws.append(w.T.astype(compute_dtype))

    x_in = x
    if padded_batch != batch:
        x_in = jnp.pad(x, ((0, padded_batch - batch), (0, 0)))
    grid = (padded_batch // tb,)

    in_specs = [pl.BlockSpec((tb, in_dim), lambda i: (i, 0))]
    for w in ws:
        # Whole weight array, same block every grid step (fetched once).
        in_specs.append(pl.BlockSpec(w.shape, lambda i: (0, 0)))
    out_specs = pl.BlockSpec((tb, out_dim), lambda i: (i, 0))

    out = pl.pallas_call(
        _make_fused_nac_kernel(num_layers, compute_dtype),
        out_shape=jax.ShapeDtypeStruct((padded_batch, out_dim), dtype),
        grid_spec=pltpu.PrefetchScalarGridSpec(
            num_scalar_prefetch=0,
            grid=grid,
            in_specs=in_specs,
            out_specs=out_specs,
        ),
        compiler_params=pltpu.CompilerParams(
            # No cross-step dependencies remain -> batch tiles are fully
            # independent and can be sharded across TensorCores (v7x).
            dimension_semantics=("parallel",),
            vmem_limit_bytes=vmem_limit,
        ),
    )(x_in, *ws)

    if padded_batch != batch:
        out = out[:batch]
    return out


def nac_multiple_cells_forward(x, params, *, compute_dtype=jnp.float32,
                               max_batch_tile=None):
    """Forward pass of NAC_multiple_cells as one fused Pallas kernel.

    x:      (batch, in_dim) float32
    params: list of (W_hat, M_hat) pairs, each (out_features, in_features),
            exactly as in the PyTorch module.
    compute_dtype: dtype fed to the MXU (f32 default = matches PyTorch;
            bf16 opt-in for higher MXU throughput, f32 accumulation kept).
    max_batch_tile: optional cap on the batch tile (mostly for testing the
            multi-tile path); by default the tile is sized from VMEM.
    """
    batch, in_dim = x.shape
    layer_widths = [in_dim] + [w_hat.shape[0] for w_hat, _ in params]
    w_itemsize = jnp.dtype(compute_dtype).itemsize
    tb, padded_batch, vmem_limit = _plan_tiling(
        batch, layer_widths, x.dtype.itemsize, w_itemsize, max_batch_tile)
    return _nac_forward_pallas(
        x, params, tb=tb, padded_batch=padded_batch, vmem_limit=vmem_limit,
        compute_dtype=compute_dtype)


# ----------------------------------------------------------------------------
# Reference + init helpers
# ----------------------------------------------------------------------------
def init_nac_params(key, num_layers, in_dim, hidden_dim, out_dim,
                    dtype=jnp.float32):
    """Deterministic kaiming_uniform(a=sqrt(5)) init -> bound = 1/sqrt(fan_in)."""
    params = []
    for i in range(num_layers):
        layer_in = hidden_dim if i > 0 else in_dim
        layer_out = hidden_dim if i < num_layers - 1 else out_dim
        key, k_w, k_m = jax.random.split(key, 3)
        bound = 1.0 / (layer_in ** 0.5)
        w_hat = jax.random.uniform(
            k_w, (layer_out, layer_in), dtype, minval=-bound, maxval=bound)
        m_hat = jax.random.uniform(
            k_m, (layer_out, layer_in), dtype, minval=-bound, maxval=bound)
        params.append((w_hat, m_hat))
    return params


def reference_forward(x, params):
    h = x
    for w_hat, m_hat in params:
        w = jnp.tanh(w_hat) * jax.nn.sigmoid(m_hat)
        h = h @ w.T
    return h


if __name__ == "__main__":
    num_layers = 3
    in_dim, hidden_dim, out_dim = 16, 32, 8
    batch = 8

    key = jax.random.PRNGKey(0)
    key, k_x = jax.random.split(key)
    x = jax.random.normal(k_x, (batch, in_dim), dtype=jnp.float32)
    params = init_nac_params(key, num_layers, in_dim, hidden_dim, out_dim)

    # Single-tile path (grid = (1,)), f32 compute — matches reference exactly.
    out = jax.block_until_ready(nac_multiple_cells_forward(x, params))
    ref = reference_forward(x, params)
    assert out.shape == (batch, out_dim), out.shape
    assert jnp.allclose(out, ref, atol=1e-5, rtol=1e-5), (
        f"max err {jnp.max(jnp.abs(out - ref))}")

    # Multi-tile path (exercises batch grid + padding + "parallel" semantics).
    key, k_x2 = jax.random.split(key)
    x_big = jax.random.normal(k_x2, (40, in_dim), dtype=jnp.float32)
    out_big = jax.block_until_ready(
        nac_multiple_cells_forward(x_big, params, max_batch_tile=16))
    ref_big = reference_forward(x_big, params)
    assert out_big.shape == (40, out_dim), out_big.shape
    assert jnp.allclose(out_big, ref_big, atol=1e-5, rtol=1e-5), (
        f"max err {jnp.max(jnp.abs(out_big - ref_big))}")

    # Opt-in bf16 MXU path (f32 accumulation) — loose tolerance vs f32 ref.
    out_bf16 = jax.block_until_ready(
        nac_multiple_cells_forward(x_big, params, compute_dtype=jnp.bfloat16))
    assert out_bf16.shape == (40, out_dim), out_bf16.shape
    assert jnp.allclose(out_bf16, ref_big, atol=1e-1, rtol=1e-1), (
        f"max err {jnp.max(jnp.abs(out_bf16 - ref_big))}")

    print("KERNEL_OK")
</pallas_src>

<mosaic_0001>
module attributes {stable_mosaic.version = 11 : i64} {
  func.func @kernel(%arg0: i32, %arg1: memref<8x16xf32, #tpu.memory_space<vmem>>, %arg2: memref<16x32xf32, #tpu.memory_space<vmem>>, %arg3: memref<32x32xf32, #tpu.memory_space<vmem>>, %arg4: memref<32x8xf32, #tpu.memory_space<vmem>>, %arg5: memref<8x8xf32, #tpu.memory_space<vmem>>) attributes {dimension_semantics = [#tpu.dimension_semantics<parallel>], iteration_bounds = array<i64: 1>, scalar_prefetch = 0 : i64, scratch_operands = 0 : i64, tpu.core_type = #tpu.core_type<tc>, window_params = [{transform_indices = @transform_0, window_bounds = array<i64: 8, 16>}, {pipeline_mode = #tpu.pipeline_mode<synchronous>, transform_indices = @transform_1, window_bounds = array<i64: 16, 32>}, {pipeline_mode = #tpu.pipeline_mode<synchronous>, transform_indices = @transform_2, window_bounds = array<i64: 32, 32>}, {pipeline_mode = #tpu.pipeline_mode<synchronous>, transform_indices = @transform_3, window_bounds = array<i64: 32, 8>}, {transform_indices = @transform_4, window_bounds = array<i64: 8, 8>}]} {
    %c0 = arith.constant 0 : index
    %c0_0 = arith.constant 0 : index
    %0 = vector.load %arg1[%c0, %c0_0] : memref<8x16xf32, #tpu.memory_space<vmem>>, vector<8x16xf32>
    %c0_1 = arith.constant 0 : index
    %c0_2 = arith.constant 0 : index
    %1 = vector.load %arg2[%c0_1, %c0_2] : memref<16x32xf32, #tpu.memory_space<vmem>>, vector<16x32xf32>
    %cst = arith.constant dense<0.000000e+00> : vector<8x32xf32>
    %2 = tpu.matmul %0, %1, %cst {dimension_numbers = #tpu.dot_dimension_numbers<[1], [0], [0], [1], [0, 0, 1, 1], [], []>} : vector<8x16xf32>, vector<16x32xf32>, vector<8x32xf32> -> vector<8x32xf32>
    %c0_3 = arith.constant 0 : index
    %c0_4 = arith.constant 0 : index
    %3 = vector.load %arg3[%c0_3, %c0_4] : memref<32x32xf32, #tpu.memory_space<vmem>>, vector<32x32xf32>
    %cst_5 = arith.constant dense<0.000000e+00> : vector<8x32xf32>
    %4 = tpu.matmul %2, %3, %cst_5 {dimension_numbers = #tpu.dot_dimension_numbers<[1], [0], [0], [1], [0, 0, 1, 1], [], []>} : vector<8x32xf32>, vector<32x32xf32>, vector<8x32xf32> -> vector<8x32xf32>
    %c0_6 = arith.constant 0 : index
    %c0_7 = arith.constant 0 : index
    %5 = vector.load %arg4[%c0_6, %c0_7] : memref<32x8xf32, #tpu.memory_space<vmem>>, vector<32x8xf32>
    %cst_8 = arith.constant dense<0.000000e+00> : vector<8x8xf32>
    %6 = tpu.matmul %4, %5, %cst_8 {dimension_numbers = #tpu.dot_dimension_numbers<[1], [0], [0], [1], [0, 0, 1, 1], [], []>} : vector<8x32xf32>, vector<32x8xf32>, vector<8x8xf32> -> vector<8x8xf32>
    %c0_9 = arith.constant 0 : index
    %c0_10 = arith.constant 0 : index
    %7 = vector.load %arg5[%c0_9, %c0_10] : memref<8x8xf32, #tpu.memory_space<vmem>>, vector<8x8xf32>
    tpu.vector_store %arg5[%c0_9, %c0_10], %6 {strides = array<i32>} : memref<8x8xf32, #tpu.memory_space<vmem>>, vector<8x8xf32>,
    return
  }
  func.func @transform_0(%arg0: i32) -> (i32, i32) {
    %c0_i32 = arith.constant 0 : i32
    %c0_i32_0 = arith.constant 0 : i32
    return %arg0, %c0_i32 : i32, i32
  }
  func.func @transform_1(%arg0: i32) -> (i32, i32) {
    %c0_i32 = arith.constant 0 : i32
    %c0_i32_0 = arith.constant 0 : i32
    %c0_i32_1 = arith.constant 0 : i32
    return %c0_i32, %c0_i32_0 : i32, i32
  }
  func.func @transform_2(%arg0: i32) -> (i32, i32) {
    %c0_i32 = arith.constant 0 : i32
    %c0_i32_0 = arith.constant 0 : i32
    %c0_i32_1 = arith.constant 0 : i32
    return %c0_i32, %c0_i32_0 : i32, i32
  }
  func.func @transform_3(%arg0: i32) -> (i32, i32) {
    %c0_i32 = arith.constant 0 : i32
    %c0_i32_0 = arith.constant 0 : i32
    %c0_i32_1 = arith.constant 0 : i32
    return %c0_i32, %c0_i32_0 : i32, i32
  }
  func.func @transform_4(%arg0: i32) -> (i32, i32) {
    %c0_i32 = arith.constant 0 : i32
    %c0_i32_0 = arith.constant 0 : i32
    return %arg0, %c0_i32 : i32, i32
  }
}

</mosaic_0001>

<bundles_post_ra>
// kernel: _nac_forward_pallas.1
= control target key start
LH: loop header
LB: loop body
LE: loop exit
PB: predicated region body
PF: predicated region fallthrough
CT: control target
= control target key end

     0   :  { %v336_v1 = vmov 0.0   ;;  %vm337_vm0 = vmmov 0   ;;  %vm21_vm1 = vcmask 130048   ;;  %s403_s0 = inlined_call_operand.vmem [shape: f32[8,16], index: 0, kind: input, shape index: {}]   ;;  %s404_s1 = inlined_call_operand.vmem [shape: f32[16,32], index: 1, kind: input, shape index: {}]   ;;  %s405_s2 = inlined_call_operand.vmem [shape: f32[32,32], index: 2, kind: input, shape index: {}]   ;;  %s406_s3 = inlined_call_operand.vmem [shape: f32[32,8], index: 3, kind: input, shape index: {}]   ;;  %s407_s4 = inlined_call_operand.hbm [shape: f32[8,8], index: 4, kind: output, shape index: {}]  }
   0x1   :  { %v20_v0 = vld [vmem:[%s404_s1 + $0x8] sm:$0xff]  ;;  %282 = vmatprep.subr.mxu0 %v336_v1  ;;  %v19_v2 = vld [vmem:[%s404_s1] sm:$0xff]  ;;  %286 = vmatprep.mubr.msk.f32.mxu0 %vm337_vm0, %v336_v1  ;;  %v98_v3 = vld [vmem:[%s405_s2 + $0x18] sm:$0xff] }
   0x2   :  { %283 = vmatpush3.msra.mxu0 %v20_v0  ;;  %v18_v4 = vld [vmem:[%s403_s0] sm:$0xff]  ;;  %289 = vmatprep.subr.mxu1 %v336_v1  ;;  %v97_v5 = vld [vmem:[%s405_s2 + $0x10] sm:$0xff] }
   0x3   :  { %9 = vsyncpa [#allocation3], 0  ;;  %284 = vmatprep.subr.mxu0 %v336_v1  ;;  %290 = vmatpush3.msra.mxu1 %v98_v3  ;;  %v96_v6 = vld [vmem:[%s405_s2 + $0x8] sm:$0xff]  ;;  %v95_v7 = vld [vmem:[%s405_s2] sm:$0xff]  ;;  %vm99_vm2 = vcmask 261120   ;;  %s338_s8 = smov [#allocation2]  }
   0x4   :  { %285 = vmatpush3.msra.mxu0 %v19_v2  ;;  %291 = vmatprep.subr.mxu1 %v336_v1  ;;  %v176_v8 = vld [vmem:[%s406_s3 + $0x18] sm:$0xff]  ;;  %v175_v9 = vld [vmem:[%s406_s3 + $0x10] sm:$0xff]  ;;  %v174_v10 = vld [vmem:[%s406_s3 + $0x8] sm:$0xff]  ;;  %s258_s9 = sshll.u32 %s338_s8, 4  ;;  %vm250_vm3 = vcmask 64512   ;;  %s259_s9 = int_to_ptr.vmem [resolvable:$true] %s258_s9 }
   0x5   :  { %287 = vmatmul.mubr.msk.f32.vlgmr.msra.gmra.mxu0 %vm21_vm1, %v18_v4  ;;  %292 = vmatpush3.msra.mxu1 %v97_v5  ;;  %v173_v13 = vld [vmem:[%s406_s3] sm:$0xff]  ;;  %s314_s10 = scalar_lea.vmem %s259_s9, 128  ;;  %p319_p1 = scmp.lt.s32.totalorder %s259_s9, %s259_s9 }
   0x6   :  { %293 = vmatprep.subr.mxu1 %v336_v1  ;;  %297 = vmatprep.mubr.msk.f32.mxu1 %vm337_vm0, %v336_v1  ;;  %p315_p0 = scmp.ne.s32.totalorder %s259_s9, %s314_s10  ;;  %p320_p2 = scmp.lt.s32.totalorder %s314_s10, %s314_s10 }
   0x7   :  { %294 = vmatpush3.msra.mxu1 %v96_v6  ;;  %300 = vmatprep.subr.mxu0 %v336_v1 }
   0x8   :  { %295 = vmatprep.subr.mxu1 %v336_v1  ;;  %308 = vmatprep.mubr.msk.f32.mxu0 %vm337_vm0, %v336_v1  ;;  %p321_p3 = por %p320_p2, %p319_p1 }
   0x9   :  { %296 = vmatpush3.msra.mxu1 %v95_v7  ;;  %301 = vmatpush3.msra.mxu0 %v176_v8 }
   0xa   :  { %302 = vmatprep.subr.mxu0 %v336_v1  ;;  %p322_p4 = pnand %p321_p3, %p315_p0 }
   0xb   :  { %303 = vmatpush3.msra.mxu0 %v175_v9 }
   0xc   :  { %304 = vmatprep.subr.mxu0 %v336_v1 }
   0xd   :  { %305 = vmatpush3.msra.mxu0 %v174_v10 }
   0xe   :  { %306 = vmatprep.subr.mxu0 %v336_v1 }
   0xf   :  { %307 = vmatpush3.msra.mxu0 %v173_v13 }
  0xc5   :  { %v91_v11 = vpop.f32.mrf.mxu0 }
  0xc6   :  { %298 = vmatmul.mubr.msk.f32.vlgmr.msra.gmra.mxu1 %vm99_vm2, %v91_v11 }
  0xc7   :  { %v288_v12 = vpop.f32.mrf.mxu0 }
 0x186   :  { %v169_v14 = vpop.f32.mrf.mxu1 }
 0x187   :  { %309 = vmatmul.mubr.msk.f32.vlgmr.msra.gmra.mxu0 %vm99_vm2, %v169_v14 }
 0x188   :  { %v299_v15 = vpop.f32.mrf.mxu1 }
 0x247   :  { %v246_v16 = vpop.f32.mrf.mxu0 }
 0x248   :  { %251 = vst.msk [vmem:[#allocation2] sm:$0xff] %vm250_vm3, %v246_v16 }
 0x249   :  { %v310_v17 = vpop.f32.mrf.mxu0 }
 0x24a   :  { %325 = shalt.err (!%p322_p4)
}
 0x24b   :  { %261 = dma.vmem_to_hbm [thread:$0]  %s259_s9, 128, %s407_s4, [#allocation3]  }
 0x24c   :  { %334 = dma.done.wait [#allocation3], 128  }
 0x24d   :  { %335 = vsyncadd [#allocation3], 4294967168 }
 0x24e   :  { %265 = vsyncpa [#allocation3], 1 }

</bundles_post_ra>
